<compile_context>
chip_gen: v7x
topology: tpu7x:2x2x1
jax: 0.10.0
libtpu: 0.0.40
codegen_flags: <defaults>
</compile_context>

<pallas_src>
import functools
import math

import jax
import jax.numpy as jnp
from jax.experimental import pallas as pl
from jax.experimental.pallas import tpu as pltpu


def _cdiv(a, b):
    return -(-a // b)


def _lane_pack(inputdim):
    """Smallest k such that inputdim*k is a multiple of 128 (always exists)."""
    return 128 // math.gcd(int(inputdim), 128)


# --------------------------------------------------------------------------- #
# Kernel
# --------------------------------------------------------------------------- #
def _legendre_kan_kernel(scalars_ref, x_ref, coeffs_ref, bias_ref, y_ref, *,
                         degree, addbias):
    # scalars_ref: SMEM (2,) f32                   [xmin, 2/(xmax-xmin)] (global)
    # x_ref:       VMEM (tile_r | 1, W)            lane-packed input rows (native dtype)
    # coeffs_ref:  VMEM (degree, tile_r | 1, W)    per-degree coefficient slabs
    # bias_ref:    VMEM (1, W) f32                 bias pattern along the lane axis
    # y_ref:       VMEM (tile_r, W) f32
    xmin = scalars_ref[0]
    scale = scalars_ref[1]

    x = x_ref[...].astype(jnp.float32)      # cast after load (halves x bytes for bf16)
    xn = (x - xmin) * scale - 1.0           # global [-1, 1] normalization

    # Peeled first two terms: P0 = 1, P1 = xn (no ones tensor, no zero init).
    acc = coeffs_ref[0].astype(jnp.float32)
    if degree > 1:
        acc = acc + xn * coeffs_ref[1].astype(jnp.float32)

    # Legendre recursion with only two live polynomials; divides are
    # strength-reduced to Python-constant reciprocal multiplies (VPU only).
    p_prev2 = None
    p_prev = xn
    for n in range(2, degree):
        if n == 2:
            p = (3.0 * xn * xn - 1.0) * 0.5
        else:
            p = ((2.0 * n - 1.0) * xn * p_prev - (n - 1.0) * p_prev2) * (1.0 / n)
        acc = acc + p * coeffs_ref[n].astype(jnp.float32)
        p_prev2, p_prev = p_prev, p

    if addbias:
        acc = acc + bias_ref[...]           # (1, W) broadcast over rows

    # Resident (row-1) x or coeff blocks leave acc with a size-1 row axis.
    y_ref[...] = jnp.broadcast_to(acc, y_ref.shape).astype(y_ref.dtype)


# --------------------------------------------------------------------------- #
# One-time parameter re-layout (done at init, never per forward call)
# --------------------------------------------------------------------------- #
def prepare_legendre_coeffs(legendrecoeffs, dtype=jnp.float32):
    """Re-layout (outdim, inputdim, degree) -> lane-packed per-degree slabs.

    Returns:
      outdim == 1 : (degree, 1, inputdim*pack)              (kept resident in-kernel)
      outdim  > 1 : (degree, ceil(outdim/pack), inputdim*pack)
    Row padding (if any) happens here, once, instead of on every forward call.
    dtype=jnp.bfloat16 halves coefficient HBM traffic (accuracy-traded; the
    kernel still accumulates in f32).
    """
    outdim, inputdim, degree = legendrecoeffs.shape
    pack = _lane_pack(inputdim)
    c = jnp.transpose(jnp.asarray(legendrecoeffs).astype(dtype), (2, 0, 1))  # (deg,out,in)
    if outdim == 1:
        return jnp.tile(c, (1, 1, pack))
    rows_p = _cdiv(outdim, pack) * pack
    if rows_p != outdim:
        c = jnp.pad(c, ((0, 0), (0, rows_p - outdim), (0, 0)))
    return jnp.reshape(c, (degree, rows_p // pack, inputdim * pack))


# --------------------------------------------------------------------------- #
# VMEM-budgeted tiling (generation aware)
# --------------------------------------------------------------------------- #
def _derive_tiling(R2, W, degree, x_itemsize, coeff_itemsize, tile_rows_cap):
    # Physical VMEM: 128 MiB on v5e/v6e, 64 MiB on v7x. Scoped limit = half of
    # physical, capped at 64 MiB; the tile budget leaves headroom for compiler
    # scratch on top of our explicit accounting.
    phys = 64 * 1024 * 1024
    try:
        info = pltpu.get_tpu_info()
        phys = int(getattr(info, "vmem_capacity_bytes", phys) or phys)
    except Exception:
        pass
    vmem_limit = min(phys // 2, 64 * 1024 * 1024)
    budget = int(vmem_limit * 0.65)

    # Sublane alignment for non-full blocks: 8 rows for 32-bit, 16 for 16-bit,
    # 32 for 8-bit streams.
    min_item = max(1, min(int(x_itemsize), int(coeff_itemsize), 4))
    align = 32 // min_item

    # Double-buffered streams (degree coeff slabs, x, out) plus ~8 live
    # whole-block f32 temporaries (xn, acc, p, p_prev, p_prev2, casts).
    bytes_per_row = 2 * (degree * coeff_itemsize + x_itemsize + 4) * W + 8 * W * 4
    cap = budget // max(bytes_per_row, 1)
    cap = min(cap, 1024, max(align, (int(tile_rows_cap) // align) * align))
    cap = max(align, (cap // align) * align)

    if R2 <= cap:
        if R2 >= 2 * align:
            # Force >= 2 grid steps so the "parallel" row axis actually splits
            # across v7x's two TensorCores (neutral on v5e/v6e).
            tile_r = ((_cdiv(R2, 2) + align - 1) // align) * align
        else:
            tile_r = R2            # single block == full first dim (always legal)
    else:
        tile_r = cap
    return tile_r, int(vmem_limit)


# --------------------------------------------------------------------------- #
# Forward wrapper
# --------------------------------------------------------------------------- #
@functools.partial(
    jax.jit,
    static_argnames=("inputdim", "outdim", "degree", "addbias", "tile_rows_cap"))
def naive_legendre_kan_forward(x, coeffs_packed, bias, *, inputdim, outdim,
                               degree, addbias=True, tile_rows_cap=1024):
    """Pallas implementation of NaiveLegendreKANLayer.forward.

    coeffs_packed: output of prepare_legendre_coeffs (computed once at init).
    """
    xshp = x.shape
    assert xshp[-1] == inputdim
    outshape = xshp[:-1] + (outdim,)

    x2 = jnp.reshape(x, (-1, inputdim))          # native dtype; cast happens in-kernel
    n_rows = x2.shape[0]

    # Row count after the module's (N,in,deg)*(out,in,deg) leading broadcast.
    if n_rows == outdim or outdim == 1:
        r_rows = n_rows
    elif n_rows == 1:
        r_rows = outdim
    else:
        raise ValueError("module's broadcasting requires N == outdim or one of them == 1")
    # The module's final reshape only works when this holds (in practice in == out).
    assert r_rows * inputdim == n_rows * outdim, (
        "NaiveLegendreKANLayer reshape quirk: requires inputdim == outdim "
        "(or the degenerate size-1 cases)")

    pack = _lane_pack(inputdim)
    W = inputdim * pack
    R2 = _cdiv(r_rows, pack)

    coeff_resident = (outdim == 1)
    x_resident = (n_rows == 1 and r_rows > 1)

    if coeff_resident:
        assert coeffs_packed.shape == (degree, 1, W), "run prepare_legendre_coeffs first"
    else:
        assert coeffs_packed.shape == (degree, R2, W), "run prepare_legendre_coeffs first"

    # Global min/max normalization, hoisted so the row axis can be tiled.  Under
    # jit the two reductions fuse into a single read pass over x (no f32 copy of
    # x is materialized).  xmax == xmin -> inf/nan, same as the torch module.
    xf = x2.astype(jnp.float32)
    xmin = jnp.min(xf)
    xmax = jnp.max(xf)
    scalars = jnp.stack([xmin, 2.0 / (xmax - xmin)])

    tile_r, vmem_limit = _derive_tiling(R2, W, degree, x2.dtype.itemsize,
                                        coeffs_packed.dtype.itemsize, tile_rows_cap)
    grid = (_cdiv(R2, tile_r),)

    # Lane-dense packing of x: merge `pack` consecutive rows into one
    # 128-multiple lane row (pure re-layout -> unmasked full-width stores).
    # Only x gets a (tiny) row pad when needed; the padded tail rows produce
    # garbage that is sliced off after the call.
    if x_resident:
        xp = jnp.tile(x2, (1, pack))                                    # (1, W)
        x_spec = pl.BlockSpec((1, W), lambda i: (0, 0))
    else:
        rows_p = R2 * pack
        if rows_p != r_rows:
            x2 = jnp.pad(x2, ((0, rows_p - r_rows), (0, 0)))
        xp = jnp.reshape(x2, (R2, W))
        x_spec = pl.BlockSpec((tile_r, W), lambda i: (i, 0))

    if coeff_resident:
        c_spec = pl.BlockSpec((degree, 1, W), lambda i: (0, 0, 0))      # resident
    else:
        c_spec = pl.BlockSpec((degree, tile_r, W), lambda i: (0, i, 0))
        # TODO(synk): if a profile shows exposed coefficient DMA at tile
        # boundaries, add pipeline_mode=pl.Buffered(3) here and re-measure.

    if addbias:
        assert bias is not None
        assert outdim == inputdim or outdim == 1, (
            "module's bias broadcast requires outdim == inputdim (or outdim == 1)")
        b = jnp.reshape(bias, (outdim,)).astype(jnp.float32)
        b_in = jnp.broadcast_to(b, (inputdim,)) if outdim == 1 else b
        bias_row = jnp.tile(jnp.reshape(b_in, (1, inputdim)), (1, pack))
    else:
        bias_row = jnp.zeros((1, W), jnp.float32)

    kernel = functools.partial(_legendre_kan_kernel, degree=degree, addbias=addbias)

    y = pl.pallas_call(
        kernel,
        out_shape=jax.ShapeDtypeStruct((R2, W), jnp.float32),
        grid_spec=pltpu.PrefetchScalarGridSpec(
            num_scalar_prefetch=0,
            grid=grid,
            in_specs=[
                pl.BlockSpec(memory_space=pltpu.MemorySpace.SMEM),   # [xmin, scale]
                x_spec,                                              # x rows
                c_spec,                                              # coeff slabs
                pl.BlockSpec((1, W), lambda i: (0, 0)),              # bias (resident)
            ],
            out_specs=pl.BlockSpec((tile_r, W), lambda i: (i, 0)),
        ),
        compiler_params=pltpu.CompilerParams(
            dimension_semantics=("parallel",),
            vmem_limit_bytes=vmem_limit,
        ),
    )(scalars, xp, coeffs_packed, bias_row)

    # Drop packed-row tail garbage (no-op when r_rows % pack == 0).
    y_flat = jnp.reshape(y, (-1,))[: r_rows * inputdim]
    return jnp.reshape(y_flat, outshape)


# --------------------------------------------------------------------------- #
# Pure-JAX reference (transliteration of the PyTorch module) for verification
# --------------------------------------------------------------------------- #
def _reference_forward(x, legendrecoeffs, bias, *, degree, addbias=True):
    outdim, inputdim, _ = legendrecoeffs.shape
    outshape = x.shape[:-1] + (outdim,)
    x = jnp.reshape(x, (-1, inputdim)).astype(jnp.float32)
    x = 2.0 * (x - jnp.min(x)) / (jnp.max(x) - jnp.min(x)) - 1.0

    def legendre(n, xx):
        if n == 0:
            return jnp.ones_like(xx)
        if n == 1:
            return xx
        return ((2.0 * n - 1.0) * xx * legendre(n - 1, xx)
                - (n - 1.0) * legendre(n - 2, xx)) / n

    P = jnp.stack([legendre(d, x) for d in range(degree)], -1)       # (N, in, deg)
    y = jnp.sum(P * legendrecoeffs.astype(jnp.float32), -1)          # leading broadcast
    if addbias:
        y = y + jnp.asarray(bias, jnp.float32)
    return jnp.reshape(y, outshape)


if __name__ == "__main__":
    def run_case(key, leading, inputdim, outdim, degree, *, x_dtype=jnp.float32,
                 addbias=True, tile_rows_cap=1024):
        k_coef, k_x = jax.random.split(key)
        legendrecoeffs = (
            jax.random.normal(k_coef, (outdim, inputdim, degree), dtype=jnp.float32)
            / (math.sqrt(inputdim) * math.sqrt(degree)))
        bias = (0.01 * jax.random.normal(jax.random.fold_in(key, 7), (1, outdim),
                                         dtype=jnp.float32)) if addbias else None
        x = jax.random.normal(k_x, leading + (inputdim,),
                              dtype=jnp.float32).astype(x_dtype)

        coeffs_packed = prepare_legendre_coeffs(legendrecoeffs)      # one-time layout
        y = naive_legendre_kan_forward(
            x, coeffs_packed, bias, inputdim=inputdim, outdim=outdim, degree=degree,
            addbias=addbias, tile_rows_cap=tile_rows_cap)
        y = jax.block_until_ready(y)

        y_ref = _reference_forward(x, legendrecoeffs, bias, degree=degree,
                                   addbias=addbias)
        assert y.shape == leading + (outdim,)
        assert jnp.allclose(y, y_ref, atol=1e-4, rtol=1e-4), \
            "mismatch vs pure-JAX reference"

    key = jax.random.PRNGKey(0)
    ks = jax.random.split(key, 4)

    # 1) Lane-packing path (in=16 -> pack=8, W=128); single full-dim block.
    run_case(ks[0], (2, 8), inputdim=16, outdim=16, degree=5)

    # 2) Lane-dense, multi-step row grid with a ragged last block
    #    (128 packed rows, tile 48 -> blocks of 48/48/32): no-pad cdiv path.
    run_case(ks[1], (8, 16), inputdim=128, outdim=128, degree=4, tile_rows_cap=48)

    # 3) Same config, default tiling: forced >=2 grid steps (megacore split).
    run_case(ks[1], (8, 16), inputdim=128, outdim=128, degree=4)

    # 4) x-only row padding (24 rows, pack=16 -> 32) + bf16 input exercising the
    #    in-kernel cast; coefficients were row-padded once at prepare time.
    run_case(ks[2], (4, 6), inputdim=24, outdim=24, degree=6, x_dtype=jnp.bfloat16)

    # 5) outdim == 1 resident-coefficient path (inputdim must be 1 for the
    #    module's own reshape to work); pack=128 with x row padding.
    run_case(ks[3], (64, 3), inputdim=1, outdim=1, degree=4)

    print("KERNEL_OK")
</pallas_src>

<mosaic_0001>
module attributes {stable_mosaic.version = 11 : i64} {
  func.func @_legendre_kan_kernel(%arg0: i32, %arg1: memref<2xf32, #tpu.memory_space<smem>>, %arg2: memref<2x128xf32, #tpu.memory_space<vmem>>, %arg3: memref<5x2x128xf32, #tpu.memory_space<vmem>>, %arg4: memref<1x128xf32, #tpu.memory_space<vmem>>, %arg5: memref<2x128xf32, #tpu.memory_space<vmem>>) attributes {dimension_semantics = [#tpu.dimension_semantics<parallel>], iteration_bounds = array<i64: 1>, scalar_prefetch = 0 : i64, scratch_operands = 0 : i64, tpu.core_type = #tpu.core_type<tc>, window_params = [{transform_indices = @transform_0, window_bounds = array<i64: 2>}, {transform_indices = @transform_1, window_bounds = array<i64: 2, 128>}, {transform_indices = @transform_2, window_bounds = array<i64: 5, 2, 128>}, {pipeline_mode = #tpu.pipeline_mode<synchronous>, transform_indices = @transform_3, window_bounds = array<i64: 1, 128>}, {transform_indices = @transform_4, window_bounds = array<i64: 2, 128>}]} {
    %c0 = arith.constant 0 : index
    %0 = memref.load %arg1[%c0] : memref<2xf32, #tpu.memory_space<smem>>
    %c1 = arith.constant 1 : index
    %1 = memref.load %arg1[%c1] : memref<2xf32, #tpu.memory_space<smem>>
    %c0_0 = arith.constant 0 : index
    %c0_1 = arith.constant 0 : index
    %2 = vector.load %arg2[%c0_0, %c0_1] : memref<2x128xf32, #tpu.memory_space<vmem>>, vector<2x128xf32>
    %3 = vector.broadcast %0 : f32 to vector<2x128xf32>
    %4 = arith.subf %2, %3 : vector<2x128xf32>
    %5 = vector.broadcast %1 : f32 to vector<2x128xf32>
    %6 = arith.mulf %4, %5 : vector<2x128xf32>
    %cst = arith.constant 1.000000e+00 : f32
    %7 = vector.broadcast %cst : f32 to vector<2x128xf32>
    %8 = arith.subf %6, %7 : vector<2x128xf32>
    %c0_2 = arith.constant 0 : index
    %c0_3 = arith.constant 0 : index
    %c0_4 = arith.constant 0 : index
    %9 = vector.load %arg3[%c0_2, %c0_3, %c0_4] : memref<5x2x128xf32, #tpu.memory_space<vmem>>, vector<1x2x128xf32>
    %10 = vector.shape_cast %9 : vector<1x2x128xf32> to vector<2x128xf32>
    %c1_5 = arith.constant 1 : index
    %c0_6 = arith.constant 0 : index
    %c0_7 = arith.constant 0 : index
    %11 = vector.load %arg3[%c1_5, %c0_6, %c0_7] : memref<5x2x128xf32, #tpu.memory_space<vmem>>, vector<1x2x128xf32>
    %12 = vector.shape_cast %11 : vector<1x2x128xf32> to vector<2x128xf32>
    %13 = arith.mulf %8, %12 : vector<2x128xf32>
    %14 = arith.addf %10, %13 : vector<2x128xf32>
    %cst_8 = arith.constant 3.000000e+00 : f32
    %15 = vector.broadcast %cst_8 : f32 to vector<2x128xf32>
    %16 = arith.mulf %15, %8 : vector<2x128xf32>
    %17 = arith.mulf %16, %8 : vector<2x128xf32>
    %cst_9 = arith.constant 1.000000e+00 : f32
    %18 = vector.broadcast %cst_9 : f32 to vector<2x128xf32>
    %19 = arith.subf %17, %18 : vector<2x128xf32>
    %cst_10 = arith.constant 5.000000e-01 : f32
    %20 = vector.broadcast %cst_10 : f32 to vector<2x128xf32>
    %21 = arith.mulf %19, %20 : vector<2x128xf32>
    %c2 = arith.constant 2 : index
    %c0_11 = arith.constant 0 : index
    %c0_12 = arith.constant 0 : index
    %22 = vector.load %arg3[%c2, %c0_11, %c0_12] : memref<5x2x128xf32, #tpu.memory_space<vmem>>, vector<1x2x128xf32>
    %23 = vector.shape_cast %22 : vector<1x2x128xf32> to vector<2x128xf32>
    %24 = arith.mulf %21, %23 : vector<2x128xf32>
    %25 = arith.addf %14, %24 : vector<2x128xf32>
    %cst_13 = arith.constant 5.000000e+00 : f32
    %26 = vector.broadcast %cst_13 : f32 to vector<2x128xf32>
    %27 = arith.mulf %26, %8 : vector<2x128xf32>
    %28 = arith.mulf %27, %21 : vector<2x128xf32>
    %cst_14 = arith.constant 2.000000e+00 : f32
    %29 = vector.broadcast %cst_14 : f32 to vector<2x128xf32>
    %30 = arith.mulf %29, %8 : vector<2x128xf32>
    %31 = arith.subf %28, %30 : vector<2x128xf32>
    %cst_15 = arith.constant 0.333333343 : f32
    %32 = vector.broadcast %cst_15 : f32 to vector<2x128xf32>
    %33 = arith.mulf %31, %32 : vector<2x128xf32>
    %c3 = arith.constant 3 : index
    %c0_16 = arith.constant 0 : index
    %c0_17 = arith.constant 0 : index
    %34 = vector.load %arg3[%c3, %c0_16, %c0_17] : memref<5x2x128xf32, #tpu.memory_space<vmem>>, vector<1x2x128xf32>
    %35 = vector.shape_cast %34 : vector<1x2x128xf32> to vector<2x128xf32>
    %36 = arith.mulf %33, %35 : vector<2x128xf32>
    %37 = arith.addf %25, %36 : vector<2x128xf32>
    %cst_18 = arith.constant 7.000000e+00 : f32
    %38 = vector.broadcast %cst_18 : f32 to vector<2x128xf32>
    %39 = arith.mulf %38, %8 : vector<2x128xf32>
    %40 = arith.mulf %39, %33 : vector<2x128xf32>
    %cst_19 = arith.constant 3.000000e+00 : f32
    %41 = vector.broadcast %cst_19 : f32 to vector<2x128xf32>
    %42 = arith.mulf %41, %21 : vector<2x128xf32>
    %43 = arith.subf %40, %42 : vector<2x128xf32>
    %cst_20 = arith.constant 2.500000e-01 : f32
    %44 = vector.broadcast %cst_20 : f32 to vector<2x128xf32>
    %45 = arith.mulf %43, %44 : vector<2x128xf32>
    %c4 = arith.constant 4 : index
    %c0_21 = arith.constant 0 : index
    %c0_22 = arith.constant 0 : index
    %46 = vector.load %arg3[%c4, %c0_21, %c0_22] : memref<5x2x128xf32, #tpu.memory_space<vmem>>, vector<1x2x128xf32>
    %47 = vector.shape_cast %46 : vector<1x2x128xf32> to vector<2x128xf32>
    %48 = arith.mulf %45, %47 : vector<2x128xf32>
    %49 = arith.addf %37, %48 : vector<2x128xf32>
    %c0_23 = arith.constant 0 : index
    %c0_24 = arith.constant 0 : index
    %50 = vector.load %arg4[%c0_23, %c0_24] : memref<1x128xf32, #tpu.memory_space<vmem>>, vector<1x128xf32>
    %51 = vector.broadcast %50 : vector<1x128xf32> to vector<2x128xf32>
    %52 = arith.addf %49, %51 : vector<2x128xf32>
    %c0_25 = arith.constant 0 : index
    %c0_26 = arith.constant 0 : index
    %53 = vector.load %arg5[%c0_25, %c0_26] : memref<2x128xf32, #tpu.memory_space<vmem>>, vector<2x128xf32>
    tpu.vector_store %arg5[%c0_25, %c0_26], %52 {strides = array<i32>} : memref<2x128xf32, #tpu.memory_space<vmem>>, vector<2x128xf32>,
    return
  }
  func.func @transform_0(%arg0: i32) -> i32 {
    %c0_i32 = arith.constant 0 : i32
    %c0_i32_0 = arith.constant 0 : i32
    return %c0_i32 : i32
  }
  func.func @transform_1(%arg0: i32) -> (i32, i32) {
    %c0_i32 = arith.constant 0 : i32
    %c0_i32_0 = arith.constant 0 : i32
    return %arg0, %c0_i32 : i32, i32
  }
  func.func @transform_2(%arg0: i32) -> (i32, i32, i32) {
    %c0_i32 = arith.constant 0 : i32
    %c0_i32_0 = arith.constant 0 : i32
    %c0_i32_1 = arith.constant 0 : i32
    return %c0_i32, %arg0, %c0_i32_0 : i32, i32, i32
  }
  func.func @transform_3(%arg0: i32) -> (i32, i32) {
    %c0_i32 = arith.constant 0 : i32
    %c0_i32_0 = arith.constant 0 : i32
    %c0_i32_1 = arith.constant 0 : i32
    return %c0_i32, %c0_i32_0 : i32, i32
  }
  func.func @transform_4(%arg0: i32) -> (i32, i32) {
    %c0_i32 = arith.constant 0 : i32
    %c0_i32_0 = arith.constant 0 : i32
    return %arg0, %c0_i32 : i32, i32
  }
}

</mosaic_0001>

<bundles_post_ra>
// kernel: naive_legendre_kan_forward.1
= control target key start
LH: loop header
LB: loop body
LE: loop exit
PB: predicated region body
PF: predicated region fallthrough
CT: control target
= control target key end

     0   :  { %9 = vsyncpa [#allocation3], 0  ;;  %s159_s0 = inlined_call_operand.vmem [shape: f32[2], index: 0, kind: input, shape index: {}]   ;;  %s160_s1 = inlined_call_operand.vmem [shape: f32[2,128], index: 1, kind: input, shape index: {}]   ;;  %s161_s2 = inlined_call_operand.vmem [shape: f32[5,2,128], index: 2, kind: input, shape index: {}]   ;;  %s162_s3 = inlined_call_operand.vmem [shape: f32[1,128], index: 3, kind: input, shape index: {}]   ;;  %s163_s4 = inlined_call_operand.vmem [shape: f32[2,128], index: 4, kind: output, shape index: {}]  }
   0x1   :  { %s16_s17 = sshll.u32 %s159_s0, 4  ;;  %s17_s17 = int_to_ptr.vmem [resolvable:$true] %s16_s17 }
   0x2   :  { %s92_s18 = scalar_lea.vmem %s17_s17, 16  ;;  %p97_p1 = scmp.lt.s32.totalorder %s17_s17, %s17_s17 }
   0x3   :  { %p93_p0 = scmp.ne.s32.totalorder %s17_s17, %s92_s18  ;;  %p98_p2 = scmp.lt.s32.totalorder %s92_s18, %s92_s18 }
   0x5   :  { %p99_p3 = por %p98_p2, %p97_p1 }
   0x7   :  { %p100_p4 = pnand %p99_p3, %p93_p0 }
   0x9   :  { %103 = shalt.err (!%p100_p4)
}
   0xa   :  { %s106_s19 = smov [#allocation2]  }
   0xb   :  { %19 = dma.vmem_to_smem %s17_s17, 16, %s106_s19, [#allocation3]  }
   0xc   :  { %104 = dma.done.wait [#allocation3], 16  }
   0xd   :  { %105 = vsyncadd [#allocation3], 4294967280 }
   0xe   :  { %29 = sfence }
   0xf   :  { %s30_s20 = sld [smem:[#allocation2]]  ;;  %s83_s21 = sld [smem:[#allocation2 + $0x1]]  ;;  %v32_v0 = vld [vmem:[%s160_s1] sm:$0x3]  ;;  %v85_v8 = vld [vmem:[%s161_s2 + $0x2] sm:$0x3] }
  0x10   :  { %v38_v14 = vld [vmem:[%s161_s2] sm:$0x3]  ;;  %v87_v15 = vld [vmem:[%s161_s2 + $0x4] sm:$0x3]  ;;  %v88_v21 = vld [vmem:[%s161_s2 + $0x6] sm:$0x3] }
  0x11   :  { %v89_v28 = vld [vmem:[%s161_s2 + $0x8] sm:$0x3]  ;;  %v90_v32 = vld [vmem:[%s162_s3] ss:$0 sm:$0xff] }
  0x15   :  { %v33_v1 = vstv %s30_s20  ;;  %v35_v2 = vstv %s83_s21 }
  0x16   :  { %v34_v3 = vsub.f32 %v32_v0, %v33_v1 }
  0x18   :  { %v36_v4 = vmul.f32 %v35_v2, %v34_v3 }
  0x1a   :  { %v84_v5 = vadd.f32 -1.0, %v36_v4 }
  0x1c   :  { %v43_v6 = vmul.f32 3.0, %v84_v5  ;;  %v51_v10 = vmul.f32 5.0, %v84_v5  ;;  %v41_v11 = vmul.f32 %v85_v8, %v84_v5  ;;  %v53_v13 = vmul.f32 2.0, %v84_v5 }
  0x1d   :  { %v60_v20 = vmul.f32 7.0, %v84_v5 }
  0x1e   :  { %v44_v7 = vmul.f32 %v84_v5, %v43_v6  ;;  %v42_v17 = vadd.f32 %v41_v11, %v38_v14 }
  0x20   :  { %v86_v9 = vadd.f32 -1.0, %v44_v7 }
  0x22   :  { %v46_v12 = vmul.f32 0.5, %v86_v9 }
  0x24   :  { %v52_v16 = vmul.f32 %v51_v10, %v46_v12  ;;  %v49_v18 = vmul.f32 %v87_v15, %v46_v12  ;;  %v62_v23 = vmul.f32 3.0, %v46_v12 }
  0x26   :  { %v54_v19 = vsub.f32 %v52_v16, %v53_v13  ;;  %v50_v24 = vadd.f32 %v49_v18, %v42_v17 }
  0x28   :  { %v55_v22 = vmul.f32 0.33333334, %v54_v19 }
  0x2a   :  { %v58_v25 = vmul.f32 %v88_v21, %v55_v22  ;;  %v61_v26 = vmul.f32 %v60_v20, %v55_v22 }
  0x2c   :  { %v63_v27 = vsub.f32 %v61_v26, %v62_v23  ;;  %v59_v29 = vadd.f32 %v58_v25, %v50_v24 }
  0x2e   :  { %v64_v30 = vmul.f32 0.25, %v63_v27 }
  0x30   :  { %v67_v31 = vmul.f32 %v89_v28, %v64_v30 }
  0x32   :  { %v68_v33 = vadd.f32 %v67_v31, %v59_v29 }
  0x34   :  { %v76_v34 = vadd.f32 %v90_v32, %v68_v33 }
  0x36   :  { %77 = vst [vmem:[%s163_s4] sm:$0x3] %v76_v34 }
  0x37   :  { %82 = vsyncpa [#allocation3], 1 }

</bundles_post_ra>
